<compile_context>
chip_gen: v7x
topology: tpu7x:2x2x1
jax: 0.10.0
libtpu: 0.0.40
codegen_flags: <defaults>
</compile_context>

<pallas_src>
import jax
import jax.numpy as jnp
import numpy as np
from jax.experimental import pallas as pl
from jax.experimental.pallas import tpu as pltpu


def _bond_float_rbf_kernel(x_ref, gsq_ref, cs_ref, w_ref, b_ref, o_ref):
    x = x_ref[...]                           # (1, tile_n)   lane-dense bond values
    z = gsq_ref[...] * x - cs_ref[...]       # (K, tile_n)   VPU broadcast mul/sub
    rbf_t = jnp.exp(-(z * z))                # (K, tile_n)   EUP
    acc_t = jnp.dot(w_ref[...], rbf_t,       # (D, tile_n)   MXU, lane-dense result
                    preferred_element_type=jnp.float32)
    # Small (D, tile_n) -> (tile_n, D) transpose on the XLU + bias add; store in the
    # module's (N, D) layout.
    o_ref[...] = acc_t.T + b_ref[...]


def _round_up(v, m):
    return ((v + m - 1) // m) * m


def bond_float_rbf_forward(x, gamma_sqrt, centers_scaled, w_all, bias_sum,
                           *, max_tile_n=2048):
    """x: (N,) float bond features.
    gamma_sqrt:     (K, 1) f32, sqrt(gamma_f) repeated over feature f's centers.
    centers_scaled: (K, 1) f32, sqrt(gamma_f) * centers_f, concatenated over features.
    w_all:          (D, K) f32, per-feature nn.Linear weights concatenated along K.
    bias_sum:       (1, D) f32, sum of per-feature nn.Linear biases.
    Returns (N, D) f32 == BondFloatRBF.forward(x)."""
    n = int(x.shape[0])
    k = gamma_sqrt.shape[0]
    d = w_all.shape[0]
    assert centers_scaled.shape == (k, 1) and w_all.shape == (d, k)
    assert bias_sum.shape == (1, d)

    x_row = x.reshape(1, n).astype(jnp.float32)        # bonds on the lane axis (free reshape)

    # Big tiles (mem-bound kernel), multiple of 128 lanes, but clamped so the
    # "parallel" axis has >=2 grid steps when N allows (v7x megacore split).
    tile_n = max(128, min(max_tile_n, _round_up(pl.cdiv(n, 2), 128)))
    grid_n = pl.cdiv(n, tile_n)                        # ragged last block handled by Pallas

    return pl.pallas_call(
        _bond_float_rbf_kernel,
        out_shape=jax.ShapeDtypeStruct((n, d), jnp.float32),
        grid_spec=pltpu.PrefetchScalarGridSpec(
            num_scalar_prefetch=0,
            grid=(grid_n,),
            in_specs=[
                # One lane-dense tile of bond features per step.
                pl.BlockSpec((1, tile_n), lambda i: (0, i)),
                # Tiny parameters: fully resident, constant index maps.
                pl.BlockSpec((k, 1), lambda i: (0, 0)),   # sqrt(gamma) per center row
                pl.BlockSpec((k, 1), lambda i: (0, 0)),   # sqrt(gamma) * centers
                pl.BlockSpec((d, k), lambda i: (0, 0)),   # fused Linear weight
                pl.BlockSpec((1, d), lambda i: (0, 0)),   # summed Linear bias
            ],
            # Output written directly in the final (N, D) layout; last block masked.
            out_specs=pl.BlockSpec((tile_n, d), lambda i: (i, 0)),
        ),
        compiler_params=pltpu.CompilerParams(
            dimension_semantics=("parallel",)),
    )(x_row, gamma_sqrt, centers_scaled, w_all, bias_sum)


if __name__ == "__main__":
    embed_dim = 32
    n_bonds = 10
    bond_float_names = ["bond_length"]
    # Default rbf_params of the module: 20 centers in [0, 2), gamma = 10.
    rbf_params = {"bond_length": (np.arange(0, 2, 0.1, dtype=np.float32), 10.0)}

    key = jax.random.PRNGKey(0)
    kx, *kws = jax.random.split(key, 1 + 2 * len(bond_float_names))

    gsq_parts, cs_parts, w_parts, b_parts = [], [], [], []
    for i, name in enumerate(bond_float_names):
        c_np, gamma = rbf_params[name]
        c = jnp.asarray(c_np, jnp.float32)
        g_sqrt = float(np.sqrt(gamma))
        # nn.Linear(len(centers), embed_dim): weight (D, C), bias (D,) (random init).
        w = jax.random.normal(kws[2 * i], (embed_dim, c.shape[0]), jnp.float32) * 0.1
        b = jax.random.normal(kws[2 * i + 1], (embed_dim,), jnp.float32) * 0.1
        gsq_parts.append(jnp.full_like(c, g_sqrt))
        cs_parts.append(c * g_sqrt)
        w_parts.append(w)
        b_parts.append(b)

    gamma_sqrt = jnp.concatenate(gsq_parts).reshape(-1, 1)          # (K, 1)
    centers_scaled = jnp.concatenate(cs_parts).reshape(-1, 1)       # (K, 1)
    w_all = jnp.concatenate(w_parts, axis=1)                        # (D, K)
    bias_sum = jnp.sum(jnp.stack(b_parts), axis=0, keepdims=True)   # (1, D)

    bond_float_features = jax.random.uniform(
        kx, (n_bonds,), jnp.float32, 0.0, 2.0)                      # (N,)

    out = bond_float_rbf_forward(bond_float_features, gamma_sqrt,
                                 centers_scaled, w_all, bias_sum)
    out = jax.block_until_ready(out)

    # Pure-JAX reference of BondFloatRBF.forward.
    ref = jnp.zeros((n_bonds, embed_dim), jnp.float32)
    x_col = bond_float_features.reshape(-1, 1)
    for i, name in enumerate(bond_float_names):
        c_np, gamma = rbf_params[name]
        c_row = jnp.asarray(c_np, jnp.float32).reshape(1, -1)
        rbf_x = jnp.exp(-gamma * jnp.square(x_col - c_row))          # (N, C)
        ref = ref + jnp.dot(rbf_x, w_parts[i].T) + b_parts[i][None, :]

    np.testing.assert_allclose(np.asarray(out), np.asarray(ref),
                               rtol=1e-5, atol=1e-5)
    assert out.shape == (n_bonds, embed_dim)
    print("KERNEL_OK")
</pallas_src>

<mosaic_0001>
module attributes {stable_mosaic.version = 11 : i64} {
  func.func @_bond_float_rbf_kernel(%arg0: i32, %arg1: memref<1x128xf32, #tpu.memory_space<vmem>>, %arg2: memref<20x1xf32, #tpu.memory_space<vmem>>, %arg3: memref<20x1xf32, #tpu.memory_space<vmem>>, %arg4: memref<32x20xf32, #tpu.memory_space<vmem>>, %arg5: memref<1x32xf32, #tpu.memory_space<vmem>>, %arg6: memref<128x32xf32, #tpu.memory_space<vmem>>) attributes {dimension_semantics = [#tpu.dimension_semantics<parallel>], iteration_bounds = array<i64: 1>, scalar_prefetch = 0 : i64, scratch_operands = 0 : i64, tpu.core_type = #tpu.core_type<tc>, window_params = [{transform_indices = @transform_0, window_bounds = array<i64: 1, 128>}, {pipeline_mode = #tpu.pipeline_mode<synchronous>, transform_indices = @transform_1, window_bounds = array<i64: 20, 1>}, {pipeline_mode = #tpu.pipeline_mode<synchronous>, transform_indices = @transform_2, window_bounds = array<i64: 20, 1>}, {pipeline_mode = #tpu.pipeline_mode<synchronous>, transform_indices = @transform_3, window_bounds = array<i64: 32, 20>}, {pipeline_mode = #tpu.pipeline_mode<synchronous>, transform_indices = @transform_4, window_bounds = array<i64: 1, 32>}, {transform_indices = @transform_5, window_bounds = array<i64: 128, 32>}]} {
    %c0 = arith.constant 0 : index
    %c0_0 = arith.constant 0 : index
    %0 = vector.load %arg1[%c0, %c0_0] : memref<1x128xf32, #tpu.memory_space<vmem>>, vector<1x128xf32>
    %c0_1 = arith.constant 0 : index
    %c0_2 = arith.constant 0 : index
    %1 = vector.load %arg2[%c0_1, %c0_2] : memref<20x1xf32, #tpu.memory_space<vmem>>, vector<20x1xf32>
    %2 = vector.broadcast %1 : vector<20x1xf32> to vector<20x128xf32>
    %3 = vector.broadcast %0 : vector<1x128xf32> to vector<20x128xf32>
    %4 = arith.mulf %2, %3 : vector<20x128xf32>
    %c0_3 = arith.constant 0 : index
    %c0_4 = arith.constant 0 : index
    %5 = vector.load %arg3[%c0_3, %c0_4] : memref<20x1xf32, #tpu.memory_space<vmem>>, vector<20x1xf32>
    %6 = vector.broadcast %5 : vector<20x1xf32> to vector<20x128xf32>
    %7 = arith.subf %4, %6 : vector<20x128xf32>
    %8 = arith.mulf %7, %7 : vector<20x128xf32>
    %cst = arith.constant 0.000000e+00 : f32
    %9 = vector.broadcast %cst : f32 to vector<20x128xf32>
    %10 = arith.subf %9, %8 : vector<20x128xf32>
    %11 = math.exp %10 : vector<20x128xf32>
    %c0_5 = arith.constant 0 : index
    %c0_6 = arith.constant 0 : index
    %12 = vector.load %arg4[%c0_5, %c0_6] : memref<32x20xf32, #tpu.memory_space<vmem>>, vector<32x20xf32>
    %cst_7 = arith.constant dense<0.000000e+00> : vector<32x128xf32>
    %13 = tpu.matmul %12, %11, %cst_7 {dimension_numbers = #tpu.dot_dimension_numbers<[1], [0], [0], [1], [0, 0, 1, 1], [], []>} : vector<32x20xf32>, vector<20x128xf32>, vector<32x128xf32> -> vector<32x128xf32>
    %14 = tpu.transpose %13, [1, 0] : vector<32x128xf32> -> vector<128x32xf32>
    %c0_8 = arith.constant 0 : index
    %c0_9 = arith.constant 0 : index
    %15 = vector.load %arg5[%c0_8, %c0_9] : memref<1x32xf32, #tpu.memory_space<vmem>>, vector<1x32xf32>
    %16 = vector.broadcast %15 : vector<1x32xf32> to vector<128x32xf32>
    %17 = arith.addf %14, %16 : vector<128x32xf32>
    %c0_10 = arith.constant 0 : index
    %c0_11 = arith.constant 0 : index
    %18 = vector.load %arg6[%c0_10, %c0_11] : memref<128x32xf32, #tpu.memory_space<vmem>>, vector<128x32xf32>
    tpu.vector_store %arg6[%c0_10, %c0_11], %17 {strides = array<i32>} : memref<128x32xf32, #tpu.memory_space<vmem>>, vector<128x32xf32>,
    return
  }
  func.func @transform_0(%arg0: i32) -> (i32, i32) {
    %c0_i32 = arith.constant 0 : i32
    %c0_i32_0 = arith.constant 0 : i32
    return %c0_i32, %arg0 : i32, i32
  }
  func.func @transform_1(%arg0: i32) -> (i32, i32) {
    %c0_i32 = arith.constant 0 : i32
    %c0_i32_0 = arith.constant 0 : i32
    %c0_i32_1 = arith.constant 0 : i32
    return %c0_i32, %c0_i32_0 : i32, i32
  }
  func.func @transform_2(%arg0: i32) -> (i32, i32) {
    %c0_i32 = arith.constant 0 : i32
    %c0_i32_0 = arith.constant 0 : i32
    %c0_i32_1 = arith.constant 0 : i32
    return %c0_i32, %c0_i32_0 : i32, i32
  }
  func.func @transform_3(%arg0: i32) -> (i32, i32) {
    %c0_i32 = arith.constant 0 : i32
    %c0_i32_0 = arith.constant 0 : i32
    %c0_i32_1 = arith.constant 0 : i32
    return %c0_i32, %c0_i32_0 : i32, i32
  }
  func.func @transform_4(%arg0: i32) -> (i32, i32) {
    %c0_i32 = arith.constant 0 : i32
    %c0_i32_0 = arith.constant 0 : i32
    %c0_i32_1 = arith.constant 0 : i32
    return %c0_i32, %c0_i32_0 : i32, i32
  }
  func.func @transform_5(%arg0: i32) -> (i32, i32) {
    %c0_i32 = arith.constant 0 : i32
    %c0_i32_0 = arith.constant 0 : i32
    return %arg0, %c0_i32 : i32, i32
  }
}

</mosaic_0001>

<bundles_post_ra>
// kernel: tpu_custom_call.1
= control target key start
LH: loop header
LB: loop body
LE: loop exit
PB: predicated region body
PF: predicated region fallthrough
CT: control target
= control target key end

     0   :  { %v347_v2 = vmov 0   ;;  %s449_s0 = inlined_call_operand.vmem [shape: f32[1,10], index: 0, kind: input, shape index: {}]   ;;  %s450_s1 = inlined_call_operand.vmem [shape: f32[20,1], index: 1, kind: input, shape index: {}]   ;;  %s451_s2 = inlined_call_operand.vmem [shape: f32[20,1], index: 2, kind: input, shape index: {}]   ;;  %s452_s3 = inlined_call_operand.vmem [shape: f32[32,20], index: 3, kind: input, shape index: {}]   ;;  %s453_s4 = inlined_call_operand.vmem [shape: f32[1,32], index: 4, kind: input, shape index: {}]   ;;  %s454_s5 = inlined_call_operand.hbm [shape: f32[10,32], index: 5, kind: output, shape index: {}]  }
   0x1   :  { %v49_v0 = vld [vmem:[%s451_s2] sm:$0xff]  ;;  %316 = vset.pattern.permute.xlu1 %v347_v2  ;;  %315 = vset.pattern.permute.xlu0 %v347_v2 }
   0x2   :  { %v22_v1 = vld [vmem:[%s450_s1] sm:$0xff]  ;;  %54 = vperm.xlu1 %316, %v49_v0  }
   0x3   :  { %27 = vperm.xlu0 %315, %v22_v1  }
   0x4   :  { %10 = vsyncpa [#allocation3], 0  ;;  %v50_v3 = vld [vmem:[%s451_s2 + $0x8] sm:$0xff]  ;;  %v51_v5 = vld [vmem:[%s451_s2 + $0x10] sm:$0xf]  ;;  %vm86_vm0 = vcmask 162816  }
   0x5   :  { %v23_v4 = vld [vmem:[%s450_s1 + $0x8] sm:$0xff]  ;;  %v24_v6 = vld [vmem:[%s450_s1 + $0x10] sm:$0xf]  ;;  %v82_v7 = vld [vmem:[%s452_s3] sm:$0xff]  ;;  %vm99_vm1 = vcmask 1043456   ;;  %vm243_vm2 = vcmask 261120  }
   0x6   :  { %59 = vperm.xlu1 %316, %v50_v3   ;;  %296 = vmatprep.mubr.msk.f32.mxu0 %vm86_vm0, %v82_v7  ;;  %v84_v8 = vld [vmem:[%s452_s3 + $0x10] sm:$0xff]  ;;  %v276_v9 = vld [vmem:[%s449_s0] ss:$0 sm:$0xff]  ;;  %v83_v35 = vld [vmem:[%s452_s3 + $0x8] sm:$0xff] }
   0x7   :  { %32 = vperm.xlu0 %315, %v23_v4   ;;  %299 = vmatprep.mubr.msk.f32.mxu1 %vm86_vm0, %v84_v8  ;;  %v85_v36 = vld [vmem:[%s452_s3 + $0x18] sm:$0xff]  ;;  %v282_v41 = vld [vmem:[%s453_s4] ss:$0 sm:$0xff] }
   0xa   :  { %64 = vperm.xlu1 %316, %v51_v5  }
   0xb   :  { %37 = vperm.xlu0 %315, %v24_v6  }
  0x81   :  { %v55_v10 = vpop.permute.xlu1 %54 }
  0x82   :  { %v28_v11 = vpop.permute.xlu0 %27 }
  0x83   :  { %v46_v12 = vmul.f32 %v276_v9, %v28_v11 }
  0x85   :  { %v67_v13 = vsub.f32 %v46_v12, %v55_v10  ;;  %v60_v14 = vpop.permute.xlu1 %59 }
  0x86   :  { %v33_v15 = vpop.permute.xlu0 %32 }
  0x87   :  { %v70_v16 = vmul.f32 %v67_v13, %v67_v13  ;;  %v47_v17 = vmul.f32 %v276_v9, %v33_v15 }
  0x89   :  { %v73_v18 = vsub.f32 0.0, %v70_v16  ;;  %v68_v19 = vsub.f32 %v47_v17, %v60_v14  ;;  %v65_v24 = vpop.permute.xlu1 %64 }
  0x8a   :  { %v38_v20 = vpop.permute.xlu0 %37 }
  0x8b   :  { %v71_v21 = vmul.f32 %v68_v19, %v68_v19  ;;  %v48_v22 = vmul.f32 %v276_v9, %v38_v20  ;;  %v76_v23 = vmul.f32 1.442695, %v73_v18 }
  0x8d   :  { %v74_v25 = vsub.f32 0.0, %v71_v21  ;;  %v69_v26 = vsub.f32 %v48_v22, %v65_v24  ;;  %317 = vpow2.f32 %v76_v23 }
  0x8f   :  { %v78_v27 = vmul.f32 1.442695, %v74_v25  ;;  %v72_v28 = vmul.f32 %v69_v26, %v69_v26 }
  0x91   :  { %319 = vpow2.f32 %v78_v27  ;;  %v75_v29 = vsub.f32 0.0, %v72_v28 }
  0x93   :  { %v80_v30 = vmul.f32 1.442695, %v75_v29 }
  0x95   :  { %321 = vpow2.f32 %v80_v30 }
  0x97   :  { %v318_v31 = vpop.eup %317 }
  0x9b   :  { %v320_v32 = vpop.eup %319 }
  0x9c   :  { %v302_v33 = vpack.c.bf16 %v320_v32, %v318_v31 }
  0x9e   :  { %303 = vmatprep.subr.bf16.mxu0 %v302_v33  ;;  %306 = vmatprep.subr.bf16.mxu1 %v302_v33 }
  0x9f   :  { %v322_v34 = vpop.eup %321  ;;  %305 = vmatpush3.bf16.msra.mxu0 %v302_v33  ;;  %308 = vmatpush3.bf16.msra.mxu1 %v302_v33 }
  0xa0   :  { %294 = vmatprep.subr.msk.mxu0 %vm99_vm1, %v322_v34  ;;  %307 = vmatprep.subr.msk.mxu1 %vm99_vm1, %v322_v34 }
  0xa3   :  { %295 = vmatpush3.msk.msra.mxu0 %vm99_vm1, %v322_v34  ;;  %309 = vmatpush3.msk.msra.mxu1 %vm99_vm1, %v322_v34 }
  0xa4   :  { %297 = vmatmul.mubr.msk.f32.vlgmr.msra.gmra.mrb[0].mxu0 %vm86_vm0, %v83_v35  ;;  %300 = vmatmul.mubr.msk.f32.vlgmr.msra.gmra.mrb[0].mxu1 %vm86_vm0, %v85_v36 }
 0x177   :  { %v298_v37 = vpop.f32.mrb[0].mxu0  ;;  %v301_v38 = vpop.f32.mrb[0].mxu1 }
 0x178   :  { %v169_v39 = vpop.f32.mrb[1].mxu0  ;;  %v179_v40 = vpop.f32.mrb[1].mxu1 }
 0x179   :  { %188 = vxpose.xlu0.b32.start [1/4] (short) %v169_v39, 128 }
 0x17d   :  { %189 = vxpose.xlu0.b32.cont [2/4] (short) %v298_v37, 128 }
 0x181   :  { %190 = vxpose.xlu0.b32.cont [3/4] (short) %v179_v40, 128 }
 0x185   :  { %191 = vxpose.xlu0.b32.end [4/4] (short) %v301_v38, 128 }
 0x1f9   :  { %v204_v42 = vpop.trf.xlu0 }
 0x1fa   :  { %v227_v43 = vadd.f32 %v282_v41, %v204_v42 }
 0x1fc   :  { %244 = vst.msk [vmem:[#allocation2] sm:$0xff] %vm243_vm2, %v227_v43 }
 0x1fd   :  { %v205_v44 = vpop.trf.xlu0 }
 0x1fe   :  { %v228_v45 = vadd.f32 %v282_v41, %v205_v44 }
 0x200   :  { %245 = vst.msk [vmem:[#allocation2 + $0x8] sm:$0xff] %vm243_vm2, %v228_v45 }
 0x201   :  { %v206_v46 = vpop.trf.xlu0 }
 0x202   :  { %v229_v47 = vadd.f32 %v282_v41, %v206_v46 }
 0x204   :  { %246 = vst.msk [vmem:[#allocation2 + $0x10] sm:$0xff] %vm243_vm2, %v229_v47 }
 0x205   :  { %v207_v48 = vpop.trf.xlu0 }
 0x206   :  { %v230_v49 = vadd.f32 %v282_v41, %v207_v48 }
 0x208   :  { %247 = vst.msk [vmem:[#allocation2 + $0x18] sm:$0xff] %vm243_vm2, %v230_v49 }
 0x209   :  { %v208_v50 = vpop.trf.xlu0 }
 0x20a   :  { %v231_v51 = vadd.f32 %v282_v41, %v208_v50 }
 0x20c   :  { %248 = vst.msk [vmem:[#allocation2 + $0x20] sm:$0xff] %vm243_vm2, %v231_v51 }
 0x20d   :  { %v209_v52 = vpop.trf.xlu0 }
 0x20e   :  { %v232_v53 = vadd.f32 %v282_v41, %v209_v52 }
 0x210   :  { %249 = vst.msk [vmem:[#allocation2 + $0x28] sm:$0xff] %vm243_vm2, %v232_v53 }
 0x211   :  { %v210_v54 = vpop.trf.xlu0 }
 0x212   :  { %v233_v55 = vadd.f32 %v282_v41, %v210_v54 }
 0x214   :  { %250 = vst.msk [vmem:[#allocation2 + $0x30] sm:$0xff] %vm243_vm2, %v233_v55 }
 0x215   :  { %v211_v56 = vpop.trf.xlu0 }
 0x216   :  { %v234_v57 = vadd.f32 %v282_v41, %v211_v56 }
 0x218   :  { %251 = vst.msk [vmem:[#allocation2 + $0x38] sm:$0xff] %vm243_vm2, %v234_v57 }
 0x219   :  { %v212_v58 = vpop.trf.xlu0 }
 0x21a   :  { %v235_v59 = vadd.f32 %v282_v41, %v212_v58 }
 0x21c   :  { %252 = vst.msk [vmem:[#allocation2 + $0x40] sm:$0xff] %vm243_vm2, %v235_v59 }
 0x21d   :  { %v213_v60 = vpop.trf.xlu0 }
 0x21e   :  { %v236_v61 = vadd.f32 %v282_v41, %v213_v60 }
 0x220   :  { %253 = vst.msk [vmem:[#allocation2 + $0x48] sm:$0xff] %vm243_vm2, %v236_v61 }
 0x221   :  { %v214_v62 = vpop.trf.xlu0 }
 0x222   :  { %v237_v63 = vadd.f32 %v282_v41, %v214_v62 }
 0x224   :  { %254 = vst.msk [vmem:[#allocation2 + $0x50] sm:$0xff] %vm243_vm2, %v237_v63 }
 0x225   :  { %v215_v0 = vpop.trf.xlu0 }
 0x226   :  { %v238_v1 = vadd.f32 %v282_v41, %v215_v0 }
 0x228   :  { %255 = vst.msk [vmem:[#allocation2 + $0x58] sm:$0xff] %vm243_vm2, %v238_v1 }
 0x229   :  { %v216_v2 = vpop.trf.xlu0 }
 0x22a   :  { %v239_v3 = vadd.f32 %v282_v41, %v216_v2 }
 0x22c   :  { %256 = vst.msk [vmem:[#allocation2 + $0x60] sm:$0xff] %vm243_vm2, %v239_v3 }
 0x22d   :  { %v217_v4 = vpop.trf.xlu0 }
 0x22e   :  { %v240_v5 = vadd.f32 %v282_v41, %v217_v4 }
 0x230   :  { %257 = vst.msk [vmem:[#allocation2 + $0x68] sm:$0xff] %vm243_vm2, %v240_v5 }
 0x231   :  { %v218_v6 = vpop.trf.xlu0 }
 0x232   :  { %v241_v7 = vadd.f32 %v282_v41, %v218_v6 }
 0x234   :  { %258 = vst.msk [vmem:[#allocation2 + $0x70] sm:$0xff] %vm243_vm2, %v241_v7 }
 0x235   :  { %v219_v8 = vpop.trf.xlu0 }
 0x236   :  { %v242_v9 = vadd.f32 %v282_v41, %v219_v8 }
 0x238   :  { %259 = vst.msk [vmem:[#allocation2 + $0x78] sm:$0xff] %vm243_vm2, %v242_v9 }
 0x239   :  { %264 = vsyncadd [#allocation3], 1792  ;;  %s348_s3 = smov [#allocation2]  }
 0x23a   :  { %s265_s4 = sshll.u32 %s348_s3, 4  ;;  %s266_s4 = int_to_ptr.vmem [resolvable:$true] %s265_s4 }
 0x23b   :  { %s323_s14 = scalar_lea.vmem %s266_s4, 256  ;;  %s327_s15 = scalar_lea.vmem %s266_s4, 2048 }
 0x23c   :  { %p324_p0 = scmp.ne.s32.totalorder %s266_s4, %s323_s14  ;;  %p328_p1 = scmp.lt.s32.totalorder %s266_s4, %s266_s4 }
 0x23d   :  { %p329_p2 = scmp.lt.s32.totalorder %s327_s15, %s323_s14 }
 0x23f   :  { %p330_p3 = por %p329_p2, %p328_p1 }
 0x241   :  { %p331_p4 = pnand %p330_p3, %p324_p0 }
 0x243   :  { %334 = shalt.err (!%p331_p4)
}
 0x244   :  { %s335_s18 = scalar_lea.hbm %s454_s5, 256 }
 0x245   :  { %p336_p5 = scmp.ne.s32.totalorder %s454_s5, %s335_s18  ;;  %p339_p6 = scmp.lt.u32.totalorder %s335_s18, %s454_s5 }
 0x247   :  { %p341_p7 = pnand %p339_p6, %p336_p5 }
 0x249   :  { %344 = shalt.err (!%p341_p7)
}
 0x24a   :  { %s349_s23 = smov 128   ;;  %s350_s24 = smov 8  }
 0x24b   :  { %271 = dma.vmem_to_hbm [thread:$0]  %s266_s4, 256, %s454_s5, [#allocation3], %s349_s23, %s349_s23, %s350_s24  }
 0x24c   :  { %345 = dma.done.wait [#allocation3], 2048  }
 0x24d   :  { %346 = vsyncadd [#allocation3], 4294965248 }
 0x24e   :  { %275 = vsyncpa [#allocation3], 1 }

</bundles_post_ra>
